<compile_context>
chip_gen: v7x
topology: tpu7x:2x2x1
jax: 0.10.0
libtpu: 0.0.40
codegen_flags: <defaults>
</compile_context>

<pallas_src>
import functools

import jax
import jax.numpy as jnp
from jax import lax
from jax.experimental import pallas as pl
from jax.experimental.pallas import tpu as pltpu

LANE = 128
SUBLANE = 8
CHUNK_ROWS = 512          # rows per inner accumulation step (256 KiB f32)


def _cdiv(a, b):
    return -(-a // b)


def _round_up(a, b):
    return _cdiv(a, b) * b


def _make_kernel(*, weighted, alpha, beta, chunk, n_chunks, full_rows,
                 rem_lanes, need_mask):
    """Builds the Pallas kernel body.

    Each grid step streams one (chunk*n_chunks, 128) tile per input, iterates
    over it in `chunk`-row slices (keeping f32 temporaries small and
    tile-size independent), and writes an (8, 128) lane-dense partial sum.
    """
    block_rows = chunk * n_chunks

    def kernel(*refs):
        if weighted:
            x_ref, t_ref, w_ref, out_ref = refs
        else:
            x_ref, t_ref, out_ref = refs
            w_ref = None

        pid = pl.program_id(0)

        def chunk_partial(c):
            r0 = c * chunk
            start = pl.multiple_of(r0, chunk)
            x = x_ref[pl.ds(start, chunk), :].astype(jnp.float32)
            t = t_ref[pl.ds(start, chunk), :].astype(jnp.float32)
            # Numerically stable BCE-with-logits, algebraically identical to
            # the PyTorch max_val form:  max(x,0) - x*t + log1p(exp(-|x|)).
            loss = (jnp.maximum(x, 0.0) - x * t
                    + jnp.log1p(jnp.exp(-jnp.abs(x))))
            if weighted:
                w = w_ref[pl.ds(start, chunk), :].astype(jnp.float32)
                loss = loss * (alpha + beta * w)
            if need_mask:
                # Mask rows/lanes past the true element count.  Pallas
                # partial-block OOB contents are unspecified, so this is a
                # correctness requirement; it is only compiled in for ragged
                # shapes and costs a handful of VALU ops in a mem-bound kernel.
                row = lax.broadcasted_iota(jnp.int32, (chunk, LANE), 0)
                g_row = pid * block_rows + r0 + row
                valid = g_row < full_rows
                if rem_lanes:
                    lane = lax.broadcasted_iota(jnp.int32, (chunk, LANE), 1)
                    valid = valid | ((g_row == full_rows) & (lane < rem_lanes))
                loss = jnp.where(valid, loss, 0.0)
            # Sublane-blocked reduction: (chunk,128)->(chunk/8,8,128)->(8,128).
            return jnp.sum(loss.reshape(chunk // SUBLANE, SUBLANE, LANE),
                           axis=0)

        def body(c, acc):
            return acc + chunk_partial(c)

        acc = lax.fori_loop(0, n_chunks, body,
                            jnp.zeros((SUBLANE, LANE), jnp.float32),
                            unroll=n_chunks <= 16)
        out_ref[...] = acc

    return kernel


def _wbce_impl(inp, target, weight, *, alpha, beta, size_average, block_rows):
    if target.shape != inp.shape:
        raise ValueError(
            "Target size ({}) must be the same as input size ({})".format(
                target.shape, inp.shape))
    if weight is not None and weight.shape != inp.shape:
        raise ValueError("Weight size must match input size")

    n = int(inp.size)

    # ---- dispatch: drop the weight stream whenever it cannot matter --------
    #   weight=None          -> plain BCE                (PyTorch semantics)
    #   weight given, beta=0 -> alpha * BCE              (scale summed scalar)
    #   weight given, beta!=0-> (alpha + beta*w) * BCE   (3-input kernel)
    use_weight = (weight is not None) and (beta != 0.0)
    post_scale = alpha if (weight is not None and not use_weight) else 1.0

    # ---- lane-dense slab (native dtype, no wrapper astype) ------------------
    lane_rem = n % LANE
    rows = _cdiv(n, LANE)

    def prep(a):
        flat = a.reshape(-1)                 # zero-copy relayout
        if lane_rem:
            # TODO(synk): lane-ragged sizes take one minimal pad copy (to the
            # next multiple of 128); the padded elements are masked in-kernel.
            flat = jnp.pad(flat, (0, LANE - lane_rem))
        return flat.reshape(rows, LANE)

    x = prep(inp)
    t = prep(target)
    args = (x, t, prep(weight)) if use_weight else (x, t)

    # ---- tile sizing ---------------------------------------------------------
    br = max(SUBLANE, min(int(block_rows), _round_up(rows, SUBLANE)))
    if _cdiv(rows, br) < 2 and rows > SUBLANE:
        # Split into >= 2 tiles so the "parallel" grid can use both v7x cores.
        half = _cdiv(rows, 2)
        br = _round_up(half, CHUNK_ROWS if half >= CHUNK_ROWS else SUBLANE)
    num_tiles = _cdiv(rows, br)

    # Inner accumulation chunk: largest power-of-two divisor of br, <= 512.
    chunk = SUBLANE
    while chunk * 2 <= min(CHUNK_ROWS, br) and br % (chunk * 2) == 0:
        chunk *= 2
    n_chunks = br // chunk

    need_mask = (num_tiles * br != rows) or (lane_rem != 0)

    kernel = _make_kernel(weighted=use_weight, alpha=float(alpha),
                          beta=float(beta), chunk=chunk, n_chunks=n_chunks,
                          full_rows=n // LANE, rem_lanes=lane_rem,
                          need_mask=need_mask)

    tile_spec = pl.BlockSpec((br, LANE), lambda i: (i, 0))
    out_spec = pl.BlockSpec((None, SUBLANE, LANE), lambda i: (i, 0, 0))
    out_shape = jax.ShapeDtypeStruct((num_tiles, SUBLANE, LANE), jnp.float32)

    # Explicit VMEM budget: double-buffered input tiles + output + headroom
    # for the chunk-sized f32 temporaries.  Works on v5e/v6e (128 MiB phys)
    # and stays well under v7x's 64 MiB at br=8192.
    in_bytes = sum(2 * br * LANE * a.dtype.itemsize for a in args)
    vmem_limit = int(in_bytes + 2 * SUBLANE * LANE * 4 + (16 << 20))

    partials = pl.pallas_call(
        kernel,
        out_shape=out_shape,
        grid=(num_tiles,),
        in_specs=[tile_spec] * len(args),
        out_specs=out_spec,
        compiler_params=pltpu.CompilerParams(
            dimension_semantics=("parallel",),
            vmem_limit_bytes=vmem_limit),
    )(*args)

    total = jnp.sum(partials)
    if post_scale != 1.0:
        total = total * jnp.float32(post_scale)
    if size_average:
        return total / jnp.float32(n)
    return total


_wbce_jit = jax.jit(_wbce_impl,
                    static_argnames=("alpha", "beta", "size_average",
                                     "block_rows"))


def weighted_bce_with_logits_loss(inp, target, weight=None, alpha=1.0,
                                  beta=0.0, size_average=True, *,
                                  block_rows=8192):
    """Forward pass of the PyTorch WeightedBCEWithLogitsLoss module."""
    return _wbce_jit(inp, target, weight,
                     alpha=float(alpha), beta=float(beta),
                     size_average=bool(size_average),
                     block_rows=int(block_rows))


def _reference(inp, target, weight, alpha, beta, size_average=True):
    # Direct port of the PyTorch module's formulation.
    x = inp.astype(jnp.float32)
    t = target.astype(jnp.float32)
    max_val = jnp.maximum(-x, 0.0)
    loss = x - x * t + max_val + jnp.log(jnp.exp(-max_val) + jnp.exp(-x - max_val))
    if weight is not None:
        loss = alpha * loss + beta * loss * weight.astype(jnp.float32)
    return jnp.mean(loss) if size_average else jnp.sum(loss)


if __name__ == "__main__":
    key = jax.random.PRNGKey(0)
    k1, k2, k3 = jax.random.split(key, 3)

    B, C, H, W = 2, 4, 16, 16          # NCHW, like the PyTorch module's inputs
    x = jax.random.normal(k1, (B, C, H, W), dtype=jnp.float32)
    tgt = (jax.random.uniform(k2, (B, C, H, W)) > 0.5).astype(jnp.float32)
    wmap = jax.random.uniform(k3, (B, C, H, W), dtype=jnp.float32)
    alpha = 0.01   # config.EPSILON
    beta = 0.1     # config.LAMBDA_LOCAL

    def check(out, ref, tag):
        out = jax.block_until_ready(out)
        assert jnp.allclose(out, ref, rtol=1e-5, atol=1e-5), (tag, out, ref)

    # weighted, mean
    check(weighted_bce_with_logits_loss(x, tgt, wmap, alpha, beta),
          _reference(x, tgt, wmap, alpha, beta, True), "weighted-mean")

    # weighted, sum
    check(weighted_bce_with_logits_loss(x, tgt, wmap, alpha, beta,
                                        size_average=False),
          _reference(x, tgt, wmap, alpha, beta, False), "weighted-sum")

    # weight=None -> plain BCE (specialized 2-input kernel)
    check(weighted_bce_with_logits_loss(x, tgt, None, alpha, beta),
          _reference(x, tgt, None, alpha, beta, True), "no-weight")

    # weight given but beta == 0 -> weight stream dropped, alpha applied post-sum
    check(weighted_bce_with_logits_loss(x, tgt, wmap, alpha, 0.0),
          _reference(x, tgt, wmap, alpha, 0.0, True), "beta0-specialized")

    # bf16 inputs streamed natively (f32 math inside the kernel)
    xb, tb, wb = (a.astype(jnp.bfloat16) for a in (x, tgt, wmap))
    check(weighted_bce_with_logits_loss(xb, tb, wb, alpha, beta),
          _reference(xb, tb, wb, alpha, beta, True), "bf16")

    # odd-sized input: lane-ragged + partial last tile -> in-kernel masking
    xs = jax.random.normal(k1, (3, 5, 7, 11), dtype=jnp.float32)
    ts = (jax.random.uniform(k2, (3, 5, 7, 11)) > 0.5).astype(jnp.float32)
    ws = jax.random.uniform(k3, (3, 5, 7, 11), dtype=jnp.float32)
    check(weighted_bce_with_logits_loss(xs, ts, ws, alpha, beta),
          _reference(xs, ts, ws, alpha, beta, True), "ragged")

    # larger input exercising the chunked inner fori_loop (n_chunks > 1)
    xl = jax.random.normal(k1, (2, 8, 128, 128), dtype=jnp.float32)
    tl = (jax.random.uniform(k2, (2, 8, 128, 128)) > 0.5).astype(jnp.float32)
    wl = jax.random.uniform(k3, (2, 8, 128, 128), dtype=jnp.float32)
    check(weighted_bce_with_logits_loss(xl, tl, wl, alpha, beta),
          _reference(xl, tl, wl, alpha, beta, True), "chunked")

    print("KERNEL_OK")
</pallas_src>

<mosaic_0001>
module attributes {stable_mosaic.version = 11 : i64} {
  func.func @kernel(%arg0: i32, %arg1: memref<8x128xf32, #tpu.memory_space<vmem>>, %arg2: memref<8x128xf32, #tpu.memory_space<vmem>>, %arg3: memref<8x128xf32, #tpu.memory_space<vmem>>, %arg4: memref<1x8x128xf32, #tpu.memory_space<vmem>>) attributes {dimension_semantics = [#tpu.dimension_semantics<parallel>], iteration_bounds = array<i64: 2>, scalar_prefetch = 0 : i64, scratch_operands = 0 : i64, tpu.core_type = #tpu.core_type<tc>, window_params = [{transform_indices = @transform_0, window_bounds = array<i64: 8, 128>}, {transform_indices = @transform_1, window_bounds = array<i64: 8, 128>}, {transform_indices = @transform_2, window_bounds = array<i64: 8, 128>}, {transform_indices = @transform_3, window_bounds = array<i64: 1, 8, 128>}]} {
    %cst = arith.constant 0.000000e+00 : f32
    %0 = vector.broadcast %cst : f32 to vector<8x128xf32>
    %c0_i32 = arith.constant 0 : i32
    %c8_i32 = arith.constant 8 : i32
    %1 = arith.muli %c0_i32, %c8_i32 : i32
    %2 = tpu.assume_multiple %1, 8 : i32
    %3 = arith.index_cast %2 : i32 to index
    %c0 = arith.constant 0 : index
    %4 = vector.load %arg1[%3, %c0] : memref<8x128xf32, #tpu.memory_space<vmem>>, vector<8x128xf32>
    %5 = arith.index_cast %2 : i32 to index
    %c0_0 = arith.constant 0 : index
    %6 = vector.load %arg2[%5, %c0_0] : memref<8x128xf32, #tpu.memory_space<vmem>>, vector<8x128xf32>
    %cst_1 = arith.constant 0.000000e+00 : f32
    %7 = vector.broadcast %cst_1 : f32 to vector<8x128xf32>
    %8 = arith.maximumf %4, %7 : vector<8x128xf32>
    %9 = arith.mulf %4, %6 : vector<8x128xf32>
    %10 = arith.subf %8, %9 : vector<8x128xf32>
    %11 = math.absf %4 : vector<8x128xf32>
    %cst_2 = arith.constant 0.000000e+00 : f32
    %12 = vector.broadcast %cst_2 : f32 to vector<8x128xf32>
    %13 = arith.subf %12, %11 : vector<8x128xf32>
    %14 = math.exp %13 : vector<8x128xf32>
    %15 = math.log1p %14 : vector<8x128xf32>
    %16 = arith.addf %10, %15 : vector<8x128xf32>
    %17 = arith.index_cast %2 : i32 to index
    %c0_3 = arith.constant 0 : index
    %18 = vector.load %arg3[%17, %c0_3] : memref<8x128xf32, #tpu.memory_space<vmem>>, vector<8x128xf32>
    %cst_4 = arith.constant 1.000000e-01 : f32
    %19 = vector.broadcast %cst_4 : f32 to vector<8x128xf32>
    %20 = arith.mulf %19, %18 : vector<8x128xf32>
    %cst_5 = arith.constant 0.00999999977 : f32
    %21 = vector.broadcast %cst_5 : f32 to vector<8x128xf32>
    %22 = arith.addf %21, %20 : vector<8x128xf32>
    %23 = arith.mulf %16, %22 : vector<8x128xf32>
    %24 = vector.shape_cast %23 : vector<8x128xf32> to vector<1x8x128xf32>
    %cst_6 = arith.constant dense<0.000000e+00> : vector<8x128xf32>
    %25 = vector.multi_reduction <add>, %24, %cst_6 [0] : vector<1x8x128xf32> to vector<8x128xf32>
    %26 = arith.addf %0, %25 : vector<8x128xf32>
    %c1_i32 = arith.constant 1 : i32
    %c0_7 = arith.constant 0 : index
    %c0_8 = arith.constant 0 : index
    %c0_9 = arith.constant 0 : index
    %27 = vector.load %arg4[%c0_7, %c0_8, %c0_9] : memref<1x8x128xf32, #tpu.memory_space<vmem>>, vector<1x8x128xf32>
    %28 = vector.shape_cast %27 : vector<1x8x128xf32> to vector<8x128xf32>
    %29 = vector.shape_cast %26 : vector<8x128xf32> to vector<1x8x128xf32>
    tpu.vector_store %arg4[%c0_7, %c0_8, %c0_9], %29 {strides = array<i32>} : memref<1x8x128xf32, #tpu.memory_space<vmem>>, vector<1x8x128xf32>,
    return
  }
  func.func @transform_0(%arg0: i32) -> (i32, i32) {
    %c0_i32 = arith.constant 0 : i32
    %c0_i32_0 = arith.constant 0 : i32
    return %arg0, %c0_i32 : i32, i32
  }
  func.func @transform_1(%arg0: i32) -> (i32, i32) {
    %c0_i32 = arith.constant 0 : i32
    %c0_i32_0 = arith.constant 0 : i32
    return %arg0, %c0_i32 : i32, i32
  }
  func.func @transform_2(%arg0: i32) -> (i32, i32) {
    %c0_i32 = arith.constant 0 : i32
    %c0_i32_0 = arith.constant 0 : i32
    return %arg0, %c0_i32 : i32, i32
  }
  func.func @transform_3(%arg0: i32) -> (i32, i32, i32) {
    %c0_i32 = arith.constant 0 : i32
    %c0_i32_0 = arith.constant 0 : i32
    %c0_i32_1 = arith.constant 0 : i32
    return %arg0, %c0_i32, %c0_i32_0 : i32, i32, i32
  }
}

</mosaic_0001>

<bundles_post_ra>
// kernel: _wbce_impl.1
= control target key start
LH: loop header
LB: loop body
LE: loop exit
PB: predicated region body
PF: predicated region fallthrough
CT: control target
= control target key end

     0   :  { %s354_s12 = smov 0   ;;  %s383_s0 = inlined_call_operand.vmem [shape: f32[16,128], index: 0, kind: input, shape index: {}]   ;;  %s384_s1 = inlined_call_operand.vmem [shape: f32[16,128], index: 1, kind: input, shape index: {}]   ;;  %s385_s2 = inlined_call_operand.vmem [shape: f32[16,128], index: 2, kind: input, shape index: {}]   ;;  %s386_s3 = inlined_call_operand.vmem [shape: f32[2,8,128], index: 3, kind: output, shape index: {}]  }
   0x1 LB: > { %s303_s13 = sadd.s32 4294967295, %s332_s12   ;;  %p307_p0 = scmp.ge.s32.totalorder %s332_s12, 1  ;;  %s332_s12 = sphi %s354_s12, %s13_s12  }
   0x2   : > { %p154_p1 = scmp.lt.s32.totalorder %s332_s12, 3 }
   0x4   : > { %p155_p2 = pnand %p307_p0, %p154_p1 }
   0x5   : > { %p184_p3 = scmp.lt.s32.totalorder (!%p155_p2), %s303_s13, 1 }
   0x6   : > { %158 = sbr.rel (%p155_p2) target bundleno = 55 (0x37), region = 32 }
   0xd   : > { %s388_s13 = smov (!%p184_p3, %s303_s13), 1 }
   0xe   : > { %s362_s14 = sshll.u32 %s388_s13, 3 }
   0xf   : > { %s187_s17 = scalar_lea.vmem %s383_s0, %s362_s14  ;;  %s191_s20 = scalar_lea.vmem %s384_s1, %s362_s14 }
  0x10   : > { %v200_v0 = vld [vmem:[%s187_s17] sm:$0xff]  ;;  %s195_s23 = scalar_lea.vmem %s385_s2, %s362_s14  ;;  %s199_s26 = scalar_lea.vmem %s386_s3, %s362_s14 }
  0x11   : > { %v205_v1 = vand.u32 2147483647, %v200_v0  ;;  %v201_v7 = vld [vmem:[%s191_s20] sm:$0xff]  ;;  %v202_v10 = vmax.f32 %v200_v0, 0.0 }
  0x12   : > { %v219_v9 = vld [vmem:[%s195_s23] sm:$0xff]  ;;  %v203_v11 = vmul.f32 %v201_v7, %v200_v0 }
  0x13   : > { %v206_v2 = vsub.f32 0.0, %v205_v1  ;;  %v220_v13 = vmul.f32 0.1, %v219_v9 }
  0x14   : > { %v204_v16 = vsub.f32 %v202_v10, %v203_v11 }
  0x15   : > { %v207_v3 = vmul.f32 1.442695, %v206_v2  ;;  %v221_v18 = vadd.f32 0.01, %v220_v13 }
  0x17   : > { %322 = vpow2.f32 %v207_v3 }
  0x21   : > { %v323_v4 = vpop.eup %322 }
  0x22   : > { %v209_v5 = vadd.f32 1.0, %v323_v4  ;;  %v212_v6 = vmul.f32 -0.5, %v323_v4  ;;  %v215_v12 = vand.u32 2147483647, %v323_v4 }
  0x24   : > { %324 = vlog2.f32 %v209_v5  ;;  %v213_v8 = vadd.f32 1.0, %v212_v6  ;;  %vm216_vm0 = vcmp.lt.f32.partialorder %v215_v12, 0.0004427343 }
  0x26   : > { %v214_v14 = vmul.f32 %v323_v4, %v213_v8 }
  0x2e   : > { %v325_v15 = vpop.eup %324 }
  0x2f   : > { %v211_v17 = vmul.f32 0.6931472, %v325_v15 }
  0x31   : > { %v217_v19 = vsel %vm216_vm0, %v214_v14, %v211_v17 }
  0x32   : > { %v218_v20 = vadd.f32 %v217_v19, %v204_v16 }
  0x34   : > { %v222_v21 = vmul.f32 %v221_v18, %v218_v20 }
  0x36   : > { %225 = vst [vmem:[%s199_s26] sm:$0xff] %v222_v21 }
  0x37 PF: > { %s13_s12 = sadd.s32 1, %s332_s12  }
  0x38   : > { %p10_p4 = scmp.ge.s32.totalorder %s13_s12, 4  }
  0x3a   :  { %12 = sbr.rel (!%p10_p4) target bundleno = 1 (0x1), region = 68 }

</bundles_post_ra>
